<compile_context>
chip_gen: v6e
topology: v6e:2x2x1
jax: 0.10.0
libtpu: 0.0.40
codegen_flags: <defaults>
</compile_context>

<pallas_src>
import jax
import jax.numpy as jnp
from jax.experimental import pallas as pl
from jax.experimental.pallas import tpu as pltpu


def _pretrain_head_kernel(x_ref, w_ref, b_ref, o_ref):
    """One batch element per grid step.

    x_ref: (1, V, D, P)   original (un-transposed) activation slab
    w_ref: (D, L)         Linear weight, already transposed to W^T
    b_ref: (1, L)         Linear bias
    o_ref: (1, P, V*L)    output slab, already in the final [B, P, V, L] order
    """
    _, V, D, P = x_ref.shape
    L = w_ref.shape[1]

    w = w_ref[...]              # (D, L)  resident across the v-loop
    b = b_ref[...]              # (1, L)  broadcasts over the P rows

    # Static unroll over variables; V is small for PatchTST heads.
    # TODO(synk): switch to a lax.fori_loop with dynamic slicing if V is large.
    for v in range(V):
        # Contract the D axis of the original [D, P] layout: the transpose is a
        # VMEM/vreg relayout feeding the MXU, not an extra HBM pass.
        xv_t = x_ref[0, v].T                                       # (P, D)
        y = jnp.dot(xv_t, w, preferred_element_type=jnp.float32)   # (P, L)
        o_ref[0, :, v * L:(v + 1) * L] = (y + b).astype(o_ref.dtype)


def linear_pretrain_head(x, weight, bias):
    """
    x:      [B, V, D, P]  (module input, PyTorch layout)
    weight: [L, D]        (nn.Linear weight, out_features x in_features)
    bias:   [L]
    returns [B, P, V, L]
    """
    B, V, D, P = x.shape
    L = weight.shape[0]

    w_t = weight.T.astype(x.dtype)   # [D, L]  tiny, done once
    b2 = bias.reshape(1, L)

    itemsize = x.dtype.itemsize
    cost = pl.CostEstimate(
        flops=2 * B * V * P * D * L,
        transcendentals=0,
        bytes_accessed=(B * V * D * P * itemsize        # x read
                        + B * P * V * L * 4             # out write (f32)
                        + D * L * itemsize + L * 4),    # weight + bias
    )

    out = pl.pallas_call(
        _pretrain_head_kernel,
        out_shape=jax.ShapeDtypeStruct((B, P, V * L), jnp.float32),
        grid_spec=pltpu.PrefetchScalarGridSpec(
            num_scalar_prefetch=0,
            grid=(B,),
            in_specs=[
                # Full [V, D, P] slab of one batch element per step.
                pl.BlockSpec((1, V, D, P), lambda b: (b, 0, 0, 0)),
                # Weight / bias: constant block index -> stays resident in VMEM.
                pl.BlockSpec((D, L), lambda b: (0, 0)),
                pl.BlockSpec((1, L), lambda b: (0, 0)),
            ],
            # Output written directly in the permuted [B, P, V, L] order,
            # packed as [B, P, V*L] so the written block's minor dim is as
            # lane-dense as the problem allows.  The reshape below is free.
            out_specs=pl.BlockSpec((1, P, V * L), lambda b: (b, 0, 0)),
        ),
        compiler_params=pltpu.CompilerParams(
            dimension_semantics=("parallel",),   # lets v7x split b over both TCs
        ),
        cost_estimate=cost,
    )(x, w_t, b2)

    return out.reshape(B, P, V, L)


if __name__ == "__main__":
    # Small shapes consistent with the module's forward contract.
    B, V, D, P, L = 2, 4, 32, 8, 16   # batch, num_vars, model_dim, num_patches, patch_length

    key = jax.random.PRNGKey(0)
    kx, kw, kb = jax.random.split(key, 3)

    x = jax.random.normal(kx, (B, V, D, P), dtype=jnp.float32)

    # Deterministic nn.Linear-style init: U(-1/sqrt(D), 1/sqrt(D))
    bound = 1.0 / (D ** 0.5)
    weight = jax.random.uniform(kw, (L, D), minval=-bound, maxval=bound,
                                dtype=jnp.float32)
    bias = jax.random.uniform(kb, (L,), minval=-bound, maxval=bound,
                              dtype=jnp.float32)

    out = linear_pretrain_head(x, weight, bias)
    out = jax.block_until_ready(out)
    assert out.shape == (B, P, V, L), out.shape

    # Pure-JAX reference check (transpose + linear + permute fused into einsum).
    ref = jnp.einsum("bvdp,ld->bpvl", x, weight) + bias
    assert jnp.allclose(out, ref, atol=1e-5, rtol=1e-5), \
        float(jnp.max(jnp.abs(out - ref)))

    print("KERNEL_OK")
</pallas_src>

<mosaic_0001>
module attributes {stable_mosaic.version = 11 : i64} {
  func.func @_pretrain_head_kernel(%arg0: i32, %arg1: memref<1x4x32x8xf32, #tpu.memory_space<vmem>>, %arg2: memref<32x16xf32, #tpu.memory_space<vmem>>, %arg3: memref<1x16xf32, #tpu.memory_space<vmem>>, %arg4: memref<1x8x64xf32, #tpu.memory_space<vmem>>) attributes {dimension_semantics = [#tpu.dimension_semantics<parallel>], iteration_bounds = array<i64: 2>, scalar_prefetch = 0 : i64, scratch_operands = 0 : i64, tpu.core_type = #tpu.core_type<tc>, window_params = [{transform_indices = @transform_0, window_bounds = array<i64: 1, 4, 32, 8>}, {pipeline_mode = #tpu.pipeline_mode<synchronous>, transform_indices = @transform_1, window_bounds = array<i64: 32, 16>}, {pipeline_mode = #tpu.pipeline_mode<synchronous>, transform_indices = @transform_2, window_bounds = array<i64: 1, 16>}, {transform_indices = @transform_3, window_bounds = array<i64: 1, 8, 64>}]} {
    %c0 = arith.constant 0 : index
    %c0_0 = arith.constant 0 : index
    %0 = vector.load %arg2[%c0, %c0_0] : memref<32x16xf32, #tpu.memory_space<vmem>>, vector<32x16xf32>
    %c0_1 = arith.constant 0 : index
    %c0_2 = arith.constant 0 : index
    %1 = vector.load %arg3[%c0_1, %c0_2] : memref<1x16xf32, #tpu.memory_space<vmem>>, vector<1x16xf32>
    %c0_3 = arith.constant 0 : index
    %c0_4 = arith.constant 0 : index
    %c0_5 = arith.constant 0 : index
    %c0_6 = arith.constant 0 : index
    %2 = vector.load %arg1[%c0_3, %c0_4, %c0_5, %c0_6] : memref<1x4x32x8xf32, #tpu.memory_space<vmem>>, vector<1x1x32x8xf32>
    %3 = vector.shape_cast %2 : vector<1x1x32x8xf32> to vector<32x8xf32>
    %4 = tpu.transpose %3, [1, 0] : vector<32x8xf32> -> vector<8x32xf32>
    %cst = arith.constant dense<0.000000e+00> : vector<8x16xf32>
    %5 = tpu.matmul %4, %0, %cst {dimension_numbers = #tpu.dot_dimension_numbers<[1], [0], [0], [1], [0, 0, 1, 1], [], []>} : vector<8x32xf32>, vector<32x16xf32>, vector<8x16xf32> -> vector<8x16xf32>
    %6 = vector.broadcast %1 : vector<1x16xf32> to vector<8x16xf32>
    %7 = arith.addf %5, %6 : vector<8x16xf32>
    %c0_7 = arith.constant 0 : index
    %c0_8 = arith.constant 0 : index
    %c0_9 = arith.constant 0 : index
    %8 = vector.load %arg4[%c0_7, %c0_8, %c0_9] : memref<1x8x64xf32, #tpu.memory_space<vmem>>, vector<1x8x16xf32>
    %9 = vector.shape_cast %8 : vector<1x8x16xf32> to vector<8x16xf32>
    %10 = vector.shape_cast %7 : vector<8x16xf32> to vector<1x8x16xf32>
    tpu.vector_store %arg4[%c0_7, %c0_8, %c0_9], %10 {strides = array<i32>} : memref<1x8x64xf32, #tpu.memory_space<vmem>>, vector<1x8x16xf32>,
    %c0_10 = arith.constant 0 : index
    %c1 = arith.constant 1 : index
    %c0_11 = arith.constant 0 : index
    %c0_12 = arith.constant 0 : index
    %11 = vector.load %arg1[%c0_10, %c1, %c0_11, %c0_12] : memref<1x4x32x8xf32, #tpu.memory_space<vmem>>, vector<1x1x32x8xf32>
    %12 = vector.shape_cast %11 : vector<1x1x32x8xf32> to vector<32x8xf32>
    %13 = tpu.transpose %12, [1, 0] : vector<32x8xf32> -> vector<8x32xf32>
    %cst_13 = arith.constant dense<0.000000e+00> : vector<8x16xf32>
    %14 = tpu.matmul %13, %0, %cst_13 {dimension_numbers = #tpu.dot_dimension_numbers<[1], [0], [0], [1], [0, 0, 1, 1], [], []>} : vector<8x32xf32>, vector<32x16xf32>, vector<8x16xf32> -> vector<8x16xf32>
    %15 = vector.broadcast %1 : vector<1x16xf32> to vector<8x16xf32>
    %16 = arith.addf %14, %15 : vector<8x16xf32>
    %c0_14 = arith.constant 0 : index
    %c0_15 = arith.constant 0 : index
    %c16 = arith.constant 16 : index
    %17 = vector.load %arg4[%c0_14, %c0_15, %c16] : memref<1x8x64xf32, #tpu.memory_space<vmem>>, vector<1x8x16xf32>
    %18 = vector.shape_cast %17 : vector<1x8x16xf32> to vector<8x16xf32>
    %19 = vector.shape_cast %16 : vector<8x16xf32> to vector<1x8x16xf32>
    tpu.vector_store %arg4[%c0_14, %c0_15, %c16], %19 {strides = array<i32>} : memref<1x8x64xf32, #tpu.memory_space<vmem>>, vector<1x8x16xf32>,
    %c0_16 = arith.constant 0 : index
    %c2 = arith.constant 2 : index
    %c0_17 = arith.constant 0 : index
    %c0_18 = arith.constant 0 : index
    %20 = vector.load %arg1[%c0_16, %c2, %c0_17, %c0_18] : memref<1x4x32x8xf32, #tpu.memory_space<vmem>>, vector<1x1x32x8xf32>
    %21 = vector.shape_cast %20 : vector<1x1x32x8xf32> to vector<32x8xf32>
    %22 = tpu.transpose %21, [1, 0] : vector<32x8xf32> -> vector<8x32xf32>
    %cst_19 = arith.constant dense<0.000000e+00> : vector<8x16xf32>
    %23 = tpu.matmul %22, %0, %cst_19 {dimension_numbers = #tpu.dot_dimension_numbers<[1], [0], [0], [1], [0, 0, 1, 1], [], []>} : vector<8x32xf32>, vector<32x16xf32>, vector<8x16xf32> -> vector<8x16xf32>
    %24 = vector.broadcast %1 : vector<1x16xf32> to vector<8x16xf32>
    %25 = arith.addf %23, %24 : vector<8x16xf32>
    %c0_20 = arith.constant 0 : index
    %c0_21 = arith.constant 0 : index
    %c32 = arith.constant 32 : index
    %26 = vector.load %arg4[%c0_20, %c0_21, %c32] : memref<1x8x64xf32, #tpu.memory_space<vmem>>, vector<1x8x16xf32>
    %27 = vector.shape_cast %26 : vector<1x8x16xf32> to vector<8x16xf32>
    %28 = vector.shape_cast %25 : vector<8x16xf32> to vector<1x8x16xf32>
    tpu.vector_store %arg4[%c0_20, %c0_21, %c32], %28 {strides = array<i32>} : memref<1x8x64xf32, #tpu.memory_space<vmem>>, vector<1x8x16xf32>,
    %c0_22 = arith.constant 0 : index
    %c3 = arith.constant 3 : index
    %c0_23 = arith.constant 0 : index
    %c0_24 = arith.constant 0 : index
    %29 = vector.load %arg1[%c0_22, %c3, %c0_23, %c0_24] : memref<1x4x32x8xf32, #tpu.memory_space<vmem>>, vector<1x1x32x8xf32>
    %30 = vector.shape_cast %29 : vector<1x1x32x8xf32> to vector<32x8xf32>
    %31 = tpu.transpose %30, [1, 0] : vector<32x8xf32> -> vector<8x32xf32>
    %cst_25 = arith.constant dense<0.000000e+00> : vector<8x16xf32>
    %32 = tpu.matmul %31, %0, %cst_25 {dimension_numbers = #tpu.dot_dimension_numbers<[1], [0], [0], [1], [0, 0, 1, 1], [], []>} : vector<8x32xf32>, vector<32x16xf32>, vector<8x16xf32> -> vector<8x16xf32>
    %33 = vector.broadcast %1 : vector<1x16xf32> to vector<8x16xf32>
    %34 = arith.addf %32, %33 : vector<8x16xf32>
    %c0_26 = arith.constant 0 : index
    %c0_27 = arith.constant 0 : index
    %c48 = arith.constant 48 : index
    %35 = vector.load %arg4[%c0_26, %c0_27, %c48] : memref<1x8x64xf32, #tpu.memory_space<vmem>>, vector<1x8x16xf32>
    %36 = vector.shape_cast %35 : vector<1x8x16xf32> to vector<8x16xf32>
    %37 = vector.shape_cast %34 : vector<8x16xf32> to vector<1x8x16xf32>
    tpu.vector_store %arg4[%c0_26, %c0_27, %c48], %37 {strides = array<i32>} : memref<1x8x64xf32, #tpu.memory_space<vmem>>, vector<1x8x16xf32>,
    return
  }
  func.func @transform_0(%arg0: i32) -> (i32, i32, i32, i32) {
    %c0_i32 = arith.constant 0 : i32
    %c0_i32_0 = arith.constant 0 : i32
    %c0_i32_1 = arith.constant 0 : i32
    %c0_i32_2 = arith.constant 0 : i32
    return %arg0, %c0_i32, %c0_i32_0, %c0_i32_1 : i32, i32, i32, i32
  }
  func.func @transform_1(%arg0: i32) -> (i32, i32) {
    %c0_i32 = arith.constant 0 : i32
    %c0_i32_0 = arith.constant 0 : i32
    %c0_i32_1 = arith.constant 0 : i32
    return %c0_i32, %c0_i32_0 : i32, i32
  }
  func.func @transform_2(%arg0: i32) -> (i32, i32) {
    %c0_i32 = arith.constant 0 : i32
    %c0_i32_0 = arith.constant 0 : i32
    %c0_i32_1 = arith.constant 0 : i32
    return %c0_i32, %c0_i32_0 : i32, i32
  }
  func.func @transform_3(%arg0: i32) -> (i32, i32, i32) {
    %c0_i32 = arith.constant 0 : i32
    %c0_i32_0 = arith.constant 0 : i32
    %c0_i32_1 = arith.constant 0 : i32
    return %arg0, %c0_i32, %c0_i32_0 : i32, i32, i32
  }
}

</mosaic_0001>

<bundles_post_ra>
// kernel: tpu_custom_call.1
= control target key start
LH: loop header
LB: loop body
LE: loop exit
PB: predicated region body
PF: predicated region fallthrough
CT: control target
= control target key end

     0   :  { %8 = vsyncpa [#allocation3], 0  ;;  %s1114_s0 = inlined_call_operand.vmem [shape: f32[2,4,32,8], index: 0, kind: input, shape index: {}]   ;;  %s1115_s1 = inlined_call_operand.vmem [shape: f32[32,16], index: 1, kind: input, shape index: {}]   ;;  %s1116_s2 = inlined_call_operand.vmem [shape: f32[1,16], index: 2, kind: input, shape index: {}]   ;;  %s1117_s3 = inlined_call_operand.hbm [shape: f32[2,8,64], index: 3, kind: output, shape index: {}]  }
   0x1   :  { %10 = vsyncpa [#allocation3 + $0x1], 0  ;;  %s938_s12 = smov 0   ;;  %s940_s13 = smov 0  }
   0x2   :  { %s942_s14 = smov 0   ;;  %s944_s15 = smov 0  }
   0x3 LB: > { %s959_s16 = sadd.s32 4294967295, %s910_s15   ;;  %s713_s17 = sadd.s32 4294967294, %s910_s15   ;;  %s910_s15 = sphi %s944_s15, %s1123_s15   ;;  %s906_s14 = sphi %s942_s14, %s1122_s14   ;;  %s902_s13 = sphi %s940_s13, %s1121_s13   ;;  %s898_s12 = sphi %s938_s12, %s1120_s12  }
   0x4   : > { %s963_s18 = sadd.s32 1, %s910_s15   ;;  %s91_s19 = sadd.s32 1, %s906_s14 }
   0x5   : > { %s88_s20 = ssub.s32 %s910_s15, %s963_s18  ;;  %p101_p0 = scmp.ne.s32.totalorder %s906_s14, %s902_s13 }
   0x6   : > { %p89_p1 = scmp.eq.s32.totalorder %s88_s20, 0  ;;  %p102_p2 = scmp.eq.s32.totalorder %s959_s16, 1 }
   0x7   : > { %p107_p3 = scmp.ne.s32.totalorder %s902_s13, %s898_s12  ;;  %p108_p4 = scmp.eq.s32.totalorder %s713_s17, 1 }
   0x8   : > { %s974_s21 = scalar_select %p89_p1, %s906_s14, %s91_s19  }
   0x9   : > { %p976_p5 = por %p102_p2, %p101_p0  ;;  %p980_p6 = por %p108_p4, %p107_p3 }
   0xa   : > { %p716_p7 = scmp.ge.s32.totalorder %s910_s15, 1  ;;  %p140_p8 = scmp.lt.s32.totalorder %s910_s15, 3 }
   0xc   : > { %p141_p9 = pnand %p716_p7, %p140_p8 }
   0xd   : > { %p164_p10 = scmp.lt.s32.totalorder (!%p141_p9), %s959_s16, 1  ;;  %s161_s10 = sand.u32 (!%p141_p9), 1, %s902_s13  }
   0xe   : > { %144 = sbr.rel (%p141_p9) target bundleno = 494 (0x1ee), region = 32  ;;  %s717_s11 = sshll.u32 (!%p141_p9), %s161_s10, 3 }
   0xf   : > { %s914_s20 = smov (!%p141_p9), 16   ;;  %s163_s24 = scalar_lea.vmem (!%p141_p9), [#allocation2], %s717_s11 }
  0x10   : > { %s915_s25 = smov (!%p141_p9), 32   ;;  %s916_s26 = smov (!%p141_p9), 48  }
  0x11   : > { %s738_s27 = sshll.u32 (!%p141_p9), %s959_s16, 7  ;;  %s641_s5 = scalar_lea.sflag (!%p141_p9), [#allocation3], %s161_s10 }
  0x13   : > { %v990_v0 = vld [vmem:[%s1115_s1 + $0x18] sm:$0xff]  ;;  %v912_v1 = vmov 0.0   ;;  %v996_v2 = vld [vmem:[%s1115_s1 + $0x10] sm:$0xff]  ;;  %s165_s28 = scalar_select %p164_p10, %s959_s16, 1  ;;  %v1006_v3 = vld [vmem:[%s1115_s1 + $0x8] sm:$0xff]  ;;  %vm913_vm0 = vmmov 0  }
  0x14   : > { %762 = vmatprep.subr.mxu0 %v912_v1  ;;  %773 = vmatprep.subr.mxu1 %v912_v1  ;;  %v169_v6 = vld [vmem:[%s1115_s1] sm:$0xff]  ;;  %vm216_vm1 = vcmask 261120   ;;  %vm290_vm2 = vcmask 130048   ;;  %vm406_vm3 = vcmask 261248   ;;  %vm522_vm4 = vcmask 392448  }
  0x15   : > { %763 = vmatpush3.msra.mxu0 %v990_v0  ;;  %774 = vmatpush3.msra.mxu1 %v990_v0  ;;  %s741_s4 = sshll.u32 %s165_s28, 7  ;;  %v720_v25 = vld [vmem:[%s1116_s2] ss:$0 sm:$0xff]  ;;  %s654_s28 = sshll.u32 %s163_s24, 4  ;;  %vm638_vm5 = vcmask 523648   ;;  %s655_s28 = int_to_ptr.vmem [resolvable:$true] %s654_s28 }
  0x16   : > { %764 = vmatprep.subr.mxu0 %v912_v1  ;;  %775 = vmatprep.subr.mxu1 %v912_v1  ;;  %s1014_s7 = scalar_lea.vmem %s1114_s0, %s741_s4  ;;  %s1077_s4 = scalar_lea.hbm %s1117_s3, %s738_s27 }
  0x17   : > { %765 = vmatpush3.msra.mxu0 %v996_v2  ;;  %776 = vmatpush3.msra.mxu1 %v996_v2  ;;  %v174_v4 = vld [vmem:[%s1014_s7] sm:$0xff]  ;;  %v175_v7 = vld [vmem:[%s1014_s7 + $0x8] sm:$0xff]  ;;  %v176_v9 = vld [vmem:[%s1014_s7 + $0x10] sm:$0xff]  ;;  %s850_s6 = scalar_lea.vmem %s655_s28, 128 }
  0x18   : > { %766 = vmatprep.subr.mxu0 %v912_v1  ;;  %770 = vmatprep.mubr.msk.f32.mxu0 %vm913_vm0, %v912_v1  ;;  %v722_v5 = vld [vmem:[%s1014_s7 + $0x20] sm:$0xff]  ;;  %v723_v8 = vld [vmem:[%s1014_s7 + $0x28] sm:$0xff]  ;;  %v724_v10 = vld [vmem:[%s1014_s7 + $0x30] sm:$0xff]  ;;  %p851_p11 = scmp.ne.s32.totalorder %s655_s28, %s850_s6 }
  0x19   : > { %767 = vmatpush3.msra.mxu0 %v1006_v3  ;;  %777 = vmatprep.subr.mxu1 %v912_v1  ;;  %v177_v11 = vld [vmem:[%s1014_s7 + $0x18] sm:$0xff]  ;;  %v727_v13 = vld [vmem:[%s1014_s7 + $0x40] sm:$0xff]  ;;  %v728_v15 = vld [vmem:[%s1014_s7 + $0x48] sm:$0xff] }
  0x1a   : > { %178 = vxpose.xlu0.b32.start [1/4] (short) (narrow) %v174_v4, 8  ;;  %297 = vxpose.xlu1.b32.start [1/4] (short) (narrow) %v722_v5, 8  ;;  %v725_v12 = vld [vmem:[%s1014_s7 + $0x38] sm:$0xff]  ;;  %v732_v14 = vld [vmem:[%s1014_s7 + $0x60] sm:$0xff]  ;;  %v733_v16 = vld [vmem:[%s1014_s7 + $0x68] sm:$0xff]  ;;  %p852_p12 = pnand %p851_p11, %p976_p5 }
  0x1b   : > { %768 = vmatprep.subr.mxu0 %v912_v1  ;;  %778 = vmatpush3.msra.mxu1 %v1006_v3  ;;  %v729_v17 = vld [vmem:[%s1014_s7 + $0x50] sm:$0xff]  ;;  %v730_v19 = vld [vmem:[%s1014_s7 + $0x58] sm:$0xff] }
  0x1c   : > { %769 = vmatpush3.msra.mxu0 %v169_v6  ;;  %779 = vmatprep.subr.mxu1 %v912_v1  ;;  %v734_v18 = vld [vmem:[%s1014_s7 + $0x70] sm:$0xff]  ;;  %v735_v20 = vld [vmem:[%s1014_s7 + $0x78] sm:$0xff]  ;;  %p853_p13 = pneg %p852_p12  ;;  %s917_s7 = smov [#allocation2]  }
  0x1d   : > { %784 = vmatprep.subr.mxu0 %v912_v1  ;;  %780 = vmatpush3.msra.mxu1 %v169_v6  ;;  %s854_s16 = sshll.u32 %s917_s7, 4  ;;  %s855_s16 = int_to_ptr.vmem [resolvable:$false] %s854_s16 }
  0x1e   : > { %179 = vxpose.xlu0.b32.cont [2/4] (short) (narrow) %v175_v7, 8  ;;  %298 = vxpose.xlu1.b32.cont [2/4] (short) (narrow) %v723_v8, 8  ;;  %s856_s8 = scalar_lea.vmem %s855_s16, 256  ;;  %p857_p0 = scmp.lt.s32.totalorder %s655_s28, %s855_s16 }
  0x1f   : > { %781 = vmatprep.mubr.msk.f32.mxu1 %vm913_vm0, %v912_v1  ;;  %795 = vmatprep.subr.mxu1 %v912_v1  ;;  %p858_p1 = scmp.lt.s32.totalorder %s856_s8, %s850_s6 }
  0x21   : > { %p859_p2 = por %p858_p1, %p857_p0 }
  0x22   : > { %180 = vxpose.xlu0.b32.cont [3/4] (short) (narrow) %v176_v9, 8  ;;  %299 = vxpose.xlu1.b32.cont [3/4] (short) (narrow) %v724_v10, 8 }
  0x23   : > { %p860_p3 = pnand %p859_p2, %p853_p13 }
  0x26   : > { %181 = vxpose.xlu0.b32.end [4/4] (short) (narrow) %v177_v11, 8  ;;  %300 = vxpose.xlu1.b32.end [4/4] (short) (narrow) %v725_v12, 8 }
  0x2a   : > { %413 = vxpose.xlu0.b32.start [1/4] (short) (narrow) %v727_v13, 8  ;;  %529 = vxpose.xlu1.b32.start [1/4] (short) (narrow) %v732_v14, 8 }
  0x2e   : > { %414 = vxpose.xlu0.b32.cont [2/4] (short) (narrow) %v728_v15, 8  ;;  %530 = vxpose.xlu1.b32.cont [2/4] (short) (narrow) %v733_v16, 8 }
  0x32   : > { %415 = vxpose.xlu0.b32.cont [3/4] (short) (narrow) %v729_v17, 8  ;;  %531 = vxpose.xlu1.b32.cont [3/4] (short) (narrow) %v734_v18, 8 }
  0x36   : > { %416 = vxpose.xlu0.b32.end [4/4] (short) (narrow) %v730_v19, 8  ;;  %532 = vxpose.xlu1.b32.end [4/4] (short) (narrow) %v735_v20, 8 }
  0x96   : > { %v194_v21 = vpop.trf.xlu0  ;;  %v313_v22 = vpop.trf.xlu1 }
  0x97   : > { %771 = vmatmul.mubr.msk.f32.vlgmr.msra.gmra.mxu0 %vm216_vm1, %v194_v21  ;;  %782 = vmatmul.mubr.msk.f32.vlgmr.msra.gmra.mxu1 %vm216_vm1, %v313_v22 }
  0x98   : > { %785 = vmatpush3.msra.mxu0 %v990_v0  ;;  %796 = vmatpush3.msra.mxu1 %v990_v0 }
  0x99   : > { %786 = vmatprep.subr.mxu0 %v912_v1  ;;  %797 = vmatprep.subr.mxu1 %v912_v1 }
  0x9a   : > { %787 = vmatpush3.msra.mxu0 %v996_v2  ;;  %798 = vmatpush3.msra.mxu1 %v996_v2 }
  0x9b   : > { %788 = vmatprep.subr.mxu0 %v912_v1  ;;  %799 = vmatprep.subr.mxu1 %v912_v1 }
  0x9c   : > { %789 = vmatpush3.msra.mxu0 %v1006_v3  ;;  %792 = vmatprep.mubr.msk.f32.mxu0 %vm913_vm0, %v912_v1 }
  0x9d   : > { %790 = vmatprep.subr.mxu0 %v912_v1  ;;  %800 = vmatpush3.msra.mxu1 %v1006_v3 }
  0x9e   : > { %791 = vmatpush3.msra.mxu0 %v169_v6  ;;  %801 = vmatprep.subr.mxu1 %v912_v1 }
  0x9f   : > { %802 = vmatpush3.msra.mxu1 %v169_v6  ;;  %803 = vmatprep.mubr.msk.f32.mxu1 %vm913_vm0, %v912_v1 }
  0xa6   : > { %v429_v23 = vpop.trf.xlu0  ;;  %v545_v24 = vpop.trf.xlu1 }
  0xa7   : > { %793 = vmatmul.mubr.msk.f32.vlgmr.msra.gmra.mxu0 %vm216_vm1, %v429_v23  ;;  %804 = vmatmul.mubr.msk.f32.vlgmr.msra.gmra.mxu1 %vm216_vm1, %v545_v24 }
 0x157   : > { %v286_v26 = vpop.f32.mrf.mxu0  ;;  %v398_v27 = vpop.f32.mrf.mxu1 }
 0x158   : > { %v287_v28 = vadd.f32 %v720_v25, %v286_v26  ;;  %v399_v29 = vadd.f32 %v720_v25, %v398_v27 }
 0x159   : > { %v772_v30 = vpop.f32.mrf.mxu0  ;;  %v783_v31 = vpop.f32.mrf.mxu1 }
 0x15a   : > { %403 = vrot.lane.b32.xlu0 %v399_v29, %s914_s20  ;;  %291 = vst.msk [vmem:[%s163_s24] sm:$0xff] %vm290_vm2, %v287_v28 }
 0x167   : > { %v514_v32 = vpop.f32.mrf.mxu0  ;;  %v630_v33 = vpop.f32.mrf.mxu1 }
 0x168   : > { %v515_v34 = vadd.f32 %v720_v25, %v514_v32  ;;  %v631_v37 = vadd.f32 %v720_v25, %v630_v33 }
 0x169   : > { %v794_v35 = vpop.f32.mrf.mxu0  ;;  %v805_v36 = vpop.f32.mrf.mxu1 }
 0x16a   : > { %519 = vrot.lane.b32.xlu1 %v515_v34, %s915_s25 }
 0x16e   : > { %635 = vrot.lane.b32.xlu1 %v631_v37, %s916_s26 }
 0x1cc   : > { %v404_v38 = vpop.permute.xlu0 %403 }
 0x1cd   : > { %407 = vst.msk [vmem:[%s163_s24] sm:$0xff] %vm406_vm3, %v404_v38 }
 0x1dc   : > { %v520_v39 = vpop.permute.xlu1 %519 }
 0x1dd   : > { %523 = vst.msk [vmem:[%s163_s24] sm:$0xff] %vm522_vm4, %v520_v39 }
 0x1e0   : > { %v636_v40 = vpop.permute.xlu1 %635 }
 0x1e1   : > { %639 = vst.msk [vmem:[%s163_s24] sm:$0xff] %vm638_vm5, %v636_v40 }
 0x1e2   : > { %863 = shalt.err (!%p860_p3)
}
 0x1e3   : > { %s864_s9 = scalar_lea.hbm %s1077_s4, 128  ;;  %s868_s17 = scalar_lea.hbm %s1117_s3, 256 }
 0x1e4   : > { %p865_p4 = scmp.ne.s32.totalorder %s1077_s4, %s864_s9  ;;  %p869_p9 = scmp.lt.s32.totalorder %s1077_s4, %s1117_s3 }
 0x1e5   : > { %p870_p10 = scmp.lt.s32.totalorder %s868_s17, %s864_s9 }
 0x1e6   : > { %p866_p7 = pnand %p865_p4, %p976_p5 }
 0x1e7   : > { %p871_p11 = por %p870_p10, %p869_p9 }
 0x1e8   : > { %p867_p8 = pneg %p866_p7 }
 0x1ea   : > { %p872_p12 = pnand %p871_p11, %p867_p8 }
 0x1ec   : > { %875 = shalt.err (!%p872_p12)
}
 0x1ed   : > { %806 = dma.vmem_to_hbm [thread:$0]  (%p976_p5), %s655_s28, 128, %s1077_s4, %s641_s5  }
 0x1ee PF: > { %p812_p13 = scmp.ge.s32.totalorder %s910_s15, 2  ;;  %s666_s24 = sand.u32 1, %s898_s12  }
 0x1ef   : > { %s667_s25 = scalar_lea.sflag [#allocation3], %s666_s24 }
 0x1f0   : > { %p809_p0 = pnand %p812_p13, %p980_p6 }
 0x1f2   : > { %p810_p1 = pneg %p809_p0 }
 0x1f4   : > { %893 = dma.done.wait (%p810_p1), %s667_s25, 128  }
 0x1f5   : > { %895 = vsyncadd (%p810_p1), %s667_s25, 4294967168  ;;  %p13_p2 = scmp.ge.s32.totalorder %s963_s18, 4   ;;  %s1120_s12 = smov %s902_s13 }
 0x1f6   : > { %s1121_s13 = smov %s906_s14  ;;  %s1122_s14 = smov %s974_s21 }
 0x1f7   : > { %s1123_s15 = smov %s963_s18  ;;  %15 = sbr.rel (!%p13_p2) target bundleno = 3 (0x3), region = 70 }
 0x1fc   :  { %672 = vsyncpa [#allocation3], 1 }
 0x1fd   :  { %674 = vsyncpa [#allocation3 + $0x1], 1 }

</bundles_post_ra>
